<compile_context>
chip_gen: v7x
topology: tpu7x:2x2x1
jax: 0.10.0
libtpu: 0.0.40
codegen_flags: <defaults>
</compile_context>

<pallas_src>
import functools

import jax
import jax.numpy as jnp
from jax.experimental import pallas as pl
from jax.experimental.pallas import tpu as pltpu

_SEG = 128  # lane segment width used for all packed operands


def _decoder_kernel(emb_ref, h0_ref, enc_ref, w_a_ref, w_c_ref, w_gi_ref, bias_ref,
                    out_h_ref, out_a_ref, *, attn_len):
    """Runs all T decoder steps in one invocation.

    emb_ref : (T, 128) f32   token-embedding rows (lanes E: zero)
    h0_ref  : (1, 128) f32   initial hidden (lanes H: zero)
    enc_ref : (128, 128) bf16 encoder states padded (rows L:, cols H: zero)
    w_a_ref : (256, 512) bf16 [rows: emb | h] x [cols: W_ae | W_hr | W_hz | W_hn]
    w_c_ref : (256, 128) bf16 [rows: emb | applied] attention_combine
    w_gi_ref: (128, 384) bf16 [cols: W_ir | W_iz | W_in]
    bias_ref: (8, 128) f32   rows [b_ae, b_ac, b_ir, b_iz, b_in, b_hr, b_hz, b_hn]
    out_h_ref / out_a_ref : (T, 128) f32 resident outputs
    """
    f32 = jnp.float32
    bf16 = jnp.bfloat16
    n_steps = emb_ref.shape[0]

    # Hoisted loop invariants (JAX does not CSE broadcast_in_dim inside loops).
    lane = jax.lax.broadcasted_iota(jnp.int32, (1, _SEG), 1)
    attn_mask = lane < attn_len                      # valid softmax lanes
    b_ae = bias_ref[0:1, :]
    b_ac = bias_ref[1:2, :]
    b_ir = bias_ref[2:3, :]
    b_iz = bias_ref[3:4, :]
    b_in = bias_ref[4:5, :]
    b_hr = bias_ref[5:6, :]
    b_hz = bias_ref[6:7, :]
    b_hn = bias_ref[7:8, :]

    def step(t, h_prev):
        # h_prev: (1,128) f32, lanes H: are exactly zero.
        emb = emb_ref[pl.ds(t, 1), :].astype(bf16)                       # (1,128)

        # --- one MXU push: attention energy AND GRU hidden-side projections ---
        # (gh_* depend only on h_prev, so they are issued before the serial
        #  softmax -> applied -> combine chain instead of being gated behind it)
        xh = jnp.concatenate([emb, h_prev.astype(bf16)], axis=1)         # (1,256) bf16
        a = jnp.dot(xh, w_a_ref[...], preferred_element_type=f32)        # (1,512) f32
        energy = a[:, 0 * _SEG:1 * _SEG] + b_ae
        gh_r = a[:, 1 * _SEG:2 * _SEG] + b_hr
        gh_z = a[:, 2 * _SEG:3 * _SEG] + b_hz
        gh_n = a[:, 3 * _SEG:4 * _SEG] + b_hn

        # --- masked softmax over the first `attn_len` lanes (full 128-lane math) ---
        energy = jnp.where(attn_mask, energy, -1e30)
        e = jnp.exp(energy - jnp.max(energy, axis=1, keepdims=True))
        attn = e * pl.reciprocal(jnp.sum(e, axis=1, keepdims=True), approx=True)

        # --- attention_applied = attn @ enc ; relu(attention_combine([emb|applied])) ---
        applied = jnp.dot(attn.astype(bf16), enc_ref[...],
                          preferred_element_type=f32)                    # (1,128)
        ea = jnp.concatenate([emb, applied.astype(bf16)], axis=1)        # (1,256) bf16
        comb = jnp.maximum(
            jnp.dot(ea, w_c_ref[...], preferred_element_type=f32) + b_ac, 0.0)

        # --- single-step GRU (PyTorch gate order r, z, n), input-side projection ---
        gi = jnp.dot(comb.astype(bf16), w_gi_ref[...],
                     preferred_element_type=f32)                         # (1,384)
        r = jax.nn.sigmoid(gi[:, 0 * _SEG:1 * _SEG] + b_ir + gh_r)
        z = jax.nn.sigmoid(gi[:, 1 * _SEG:2 * _SEG] + b_iz + gh_z)
        n = jnp.tanh(gi[:, 2 * _SEG:3 * _SEG] + b_in + r * gh_n)
        h_new = (1.0 - z) * n + z * h_prev                               # pad lanes stay 0

        out_h_ref[pl.ds(t, 1), :] = h_new
        out_a_ref[pl.ds(t, 1), :] = attn
        return h_new

    jax.lax.fori_loop(0, n_steps, step, h0_ref[...], unroll=True)


@jax.jit
def decode_fused(params, tokens, encoder_output_states, h0):
    """Run T decoder steps in ONE pallas_call.

    Returns (hidden, attn), each (T, 128) f32:
      hidden[t, :H] = hidden state after step t, attn[t, :L] = attention weights.
    """
    tokens = tokens.astype(jnp.int32)
    T = tokens.shape[0]
    E = params["embedding"].shape[1]
    H = h0.shape[-1]
    L = encoder_output_states.shape[0]
    assert E <= _SEG and H <= _SEG and L <= _SEG

    # Embedding lookup (dropout = eval-mode identity) as a plain XLA gather;
    # rows padded to a lane-dense (T,128) slab for the kernel.
    emb_rows = params["embedding"][tokens]                               # (T, E) f32
    emb_rows = jnp.zeros((T, _SEG), jnp.float32).at[:, :E].set(emb_rows)

    h0_pad = jnp.zeros((1, _SEG), jnp.float32).at[:, :H].set(
        h0.reshape(1, -1).astype(jnp.float32))

    enc_pad = jnp.zeros((_SEG, _SEG), jnp.float32).at[:L, :H].set(
        encoder_output_states.astype(jnp.float32)).astype(jnp.bfloat16)

    kernel = functools.partial(_decoder_kernel, attn_len=L)
    vmem = lambda: pl.BlockSpec(memory_space=pltpu.MemorySpace.VMEM)
    out_h, out_a = pl.pallas_call(
        kernel,
        out_shape=(jax.ShapeDtypeStruct((T, _SEG), jnp.float32),
                   jax.ShapeDtypeStruct((T, _SEG), jnp.float32)),
        in_specs=[vmem() for _ in range(7)],
        out_specs=(vmem(), vmem()),
    )(emb_rows, h0_pad, enc_pad,
      params["w_a"], params["w_c"], params["w_gi"], params["bias"])
    return out_h, out_a


def attention_decoder_forward(params, input_x, encoder_output_states, decoder_prev_hidden):
    """Single-step forward with the same outputs as AttentionDecoder.forward()."""
    tokens = input_x.astype(jnp.int32).reshape(-1)[:1]                   # N = 1
    H = decoder_prev_hidden.shape[-1]
    L = encoder_output_states.shape[0]
    O = params["embedding"].shape[0]
    h0 = decoder_prev_hidden.reshape(1, H).astype(jnp.float32)

    out_h, out_a = decode_fused(params, tokens, encoder_output_states, h0)
    hidden = out_h[0:1, 0:H].reshape(1, 1, H)
    attn = out_a[0:1, 0:L].reshape(1, 1, L)
    # F.log_softmax with no dim on a (1,1,O) tensor reduces over the size-1 dim 0
    # -> identically zero, so the final_linear branch is dead compute.
    logp = jnp.zeros((1, 1, O), jnp.float32)
    return logp, hidden, attn


def init_params(key, embedding_size, hidden_size, output_size, max_len):
    E, H, O, L = embedding_size, hidden_size, output_size, max_len
    ks = jax.random.split(key, 12)

    def u(k, shape, fan_in):
        b = 1.0 / (fan_in ** 0.5)
        return jax.random.uniform(k, shape, jnp.float32, -b, b)

    params = {}
    params["embedding"] = jax.random.normal(ks[0], (O, E), jnp.float32)

    # attention_energy: Linear(E+H -> L), cat order [embedding | hidden]
    w_ae = u(ks[1], (E + H, L), E + H)
    b_ae = u(ks[2], (L,), E + H)
    # attention_combine: Linear(E+H -> H), cat order [embedding | attention_applied]
    w_ac = u(ks[3], (E + H, H), E + H)
    b_ac = u(ks[4], (H,), E + H)
    # GRU(hidden, hidden): per-gate transposed blocks [ir, iz, in, hr, hz, hn]
    gate_w = [u(ks[5 + i], (H, H), H) for i in range(6)]
    gate_b = [u(jax.random.fold_in(ks[11], i), (H,), H) for i in range(6)]

    # w_a (256,512): rows [emb lanes | hidden lanes]; col segments [W_ae | W_hr | W_hz | W_hn]
    w_a = jnp.zeros((2 * _SEG, 4 * _SEG), jnp.float32)
    w_a = w_a.at[0:E, 0:L].set(w_ae[0:E])
    w_a = w_a.at[_SEG:_SEG + H, 0:L].set(w_ae[E:E + H])
    for i in range(3):  # hr, hz, hn
        w_a = w_a.at[_SEG:_SEG + H, (1 + i) * _SEG:(1 + i) * _SEG + H].set(gate_w[3 + i])
    params["w_a"] = w_a.astype(jnp.bfloat16)

    # w_c (256,128): rows [emb lanes | applied lanes], cols 0:H = attention_combine
    w_c = jnp.zeros((2 * _SEG, _SEG), jnp.float32)
    w_c = w_c.at[0:E, 0:H].set(w_ac[0:E])
    w_c = w_c.at[_SEG:_SEG + H, 0:H].set(w_ac[E:E + H])
    params["w_c"] = w_c.astype(jnp.bfloat16)

    # w_gi (128,384): col segments [W_ir | W_iz | W_in], rows 0:H
    w_gi = jnp.zeros((_SEG, 3 * _SEG), jnp.float32)
    for i in range(3):
        w_gi = w_gi.at[0:H, i * _SEG:i * _SEG + H].set(gate_w[i])
    params["w_gi"] = w_gi.astype(jnp.bfloat16)

    # bias (8,128) f32: [b_ae, b_ac, b_ir, b_iz, b_in, b_hr, b_hz, b_hn] (pad lanes zero)
    bias = jnp.zeros((8, _SEG), jnp.float32)
    bias = bias.at[0, 0:L].set(b_ae).at[1, 0:H].set(b_ac)
    for i in range(6):
        bias = bias.at[2 + i, 0:H].set(gate_b[i])
    params["bias"] = bias
    # NOTE: final_linear is intentionally omitted (see log_softmax note at top of file).
    return params


def _reference_step(params, tok, enc, h_prev):
    """Pure-JAX single decoder step from the packed slabs (f32 math, no Pallas)."""
    f32 = jnp.float32
    E = params["embedding"].shape[1]
    H = h_prev.shape[1]
    L = enc.shape[0]
    w_a = params["w_a"].astype(f32)
    w_c = params["w_c"].astype(f32)
    w_gi = params["w_gi"].astype(f32)
    bias = params["bias"]
    enc_f = enc.astype(f32)

    emb = params["embedding"][tok].reshape(1, E)
    energy = emb @ w_a[0:E, 0:L] + h_prev @ w_a[_SEG:_SEG + H, 0:L] + bias[0:1, 0:L]
    attn = jax.nn.softmax(energy, axis=1)
    applied = attn @ enc_f
    comb = jnp.maximum(
        emb @ w_c[0:E, 0:H] + applied @ w_c[_SEG:_SEG + H, 0:H] + bias[1:2, 0:H], 0.0)

    def gh(i):
        return (h_prev @ w_a[_SEG:_SEG + H, (1 + i) * _SEG:(1 + i) * _SEG + H]
                + bias[5 + i:6 + i, 0:H])

    def gi(i):
        return comb @ w_gi[0:H, i * _SEG:i * _SEG + H] + bias[2 + i:3 + i, 0:H]

    r = jax.nn.sigmoid(gi(0) + gh(0))
    z = jax.nn.sigmoid(gi(1) + gh(1))
    n = jnp.tanh(gi(2) + r * gh(2))
    h_new = (1.0 - z) * n + z * h_prev
    return h_new, attn


if __name__ == "__main__":
    EMBEDDING_SIZE = 32
    HIDDEN_SIZE = 32
    OUTPUT_SIZE = 48
    MAX_LEN = 16
    T = 8

    key = jax.random.PRNGKey(0)
    k_params, k_enc, k_tok = jax.random.split(key, 3)
    params = init_params(k_params, EMBEDDING_SIZE, HIDDEN_SIZE, OUTPUT_SIZE, MAX_LEN)

    encoder_output_states = jax.random.normal(
        k_enc, (MAX_LEN, HIDDEN_SIZE), jnp.float32).astype(jnp.bfloat16)
    decoder_prev_hidden = jnp.zeros((1, 1, HIDDEN_SIZE), jnp.float32)   # initHidden()

    # ---- single-step forward (module semantics) ----
    input_x = jnp.array([3], dtype=jnp.int32)
    logp, hidden, attn_w = attention_decoder_forward(
        params, input_x, encoder_output_states, decoder_prev_hidden)
    jax.block_until_ready((logp, hidden, attn_w))

    assert logp.shape == (1, 1, OUTPUT_SIZE)
    assert hidden.shape == (1, 1, HIDDEN_SIZE)
    assert attn_w.shape == (1, 1, MAX_LEN)
    assert bool(jnp.all(logp == 0.0))
    assert bool(jnp.all(jnp.isfinite(hidden))) and bool(jnp.all(jnp.isfinite(attn_w)))

    r_h, r_attn = _reference_step(params, 3, encoder_output_states, decoder_prev_hidden[0])
    assert jnp.allclose(hidden[0], r_h, atol=5e-2), "hidden mismatch"
    assert jnp.allclose(attn_w[0], r_attn, atol=5e-2), "attention mismatch"

    # ---- fused multi-step decode: one pallas_call, one in-kernel unrolled loop ----
    tokens = jax.random.randint(k_tok, (T,), 0, OUTPUT_SIZE, dtype=jnp.int32)
    out_h, out_a = decode_fused(params, tokens, encoder_output_states,
                                decoder_prev_hidden[0])
    jax.block_until_ready((out_h, out_a))
    assert out_h.shape == (T, 128) and out_a.shape == (T, 128)
    assert bool(jnp.all(jnp.isfinite(out_h))) and bool(jnp.all(jnp.isfinite(out_a)))

    h_ref = decoder_prev_hidden[0]
    for t in range(T):
        h_ref, a_ref = _reference_step(params, int(tokens[t]), encoder_output_states, h_ref)
        assert jnp.allclose(out_h[t, :HIDDEN_SIZE], h_ref[0], atol=5e-2), f"step {t} hidden"
        assert jnp.allclose(out_a[t, :MAX_LEN], a_ref[0], atol=5e-2), f"step {t} attention"

    print("KERNEL_OK")
</pallas_src>

<mosaic_0001>
module attributes {stable_mosaic.version = 11 : i64} {
  func.func @_decoder_kernel(%arg0: memref<1x128xf32, #tpu.memory_space<vmem>>, %arg1: memref<1x128xf32, #tpu.memory_space<vmem>>, %arg2: memref<128x128xbf16, #tpu.memory_space<vmem>>, %arg3: memref<256x512xbf16, #tpu.memory_space<vmem>>, %arg4: memref<256x128xbf16, #tpu.memory_space<vmem>>, %arg5: memref<128x384xbf16, #tpu.memory_space<vmem>>, %arg6: memref<8x128xf32, #tpu.memory_space<vmem>>, %arg7: memref<1x128xf32, #tpu.memory_space<vmem>>, %arg8: memref<1x128xf32, #tpu.memory_space<vmem>>) attributes {dimension_semantics = [], scalar_prefetch = 0 : i64, scratch_operands = 0 : i64, tpu.core_type = #tpu.core_type<tc>} {
    %0 = tpu.iota {dimensions = array<i32: 1>} : vector<1x128xi32>
    %c16_i32 = arith.constant 16 : i32
    %1 = vector.broadcast %c16_i32 : i32 to vector<1x128xi32>
    %2 = arith.cmpi slt, %0, %1 : vector<1x128xi32>
    %c0 = arith.constant 0 : index
    %c0_0 = arith.constant 0 : index
    %3 = vector.load %arg6[%c0, %c0_0] : memref<8x128xf32, #tpu.memory_space<vmem>>, vector<1x128xf32>
    %c1 = arith.constant 1 : index
    %c0_1 = arith.constant 0 : index
    %4 = vector.load %arg6[%c1, %c0_1] : memref<8x128xf32, #tpu.memory_space<vmem>>, vector<1x128xf32>
    %c2 = arith.constant 2 : index
    %c0_2 = arith.constant 0 : index
    %5 = vector.load %arg6[%c2, %c0_2] : memref<8x128xf32, #tpu.memory_space<vmem>>, vector<1x128xf32>
    %c3 = arith.constant 3 : index
    %c0_3 = arith.constant 0 : index
    %6 = vector.load %arg6[%c3, %c0_3] : memref<8x128xf32, #tpu.memory_space<vmem>>, vector<1x128xf32>
    %c4 = arith.constant 4 : index
    %c0_4 = arith.constant 0 : index
    %7 = vector.load %arg6[%c4, %c0_4] : memref<8x128xf32, #tpu.memory_space<vmem>>, vector<1x128xf32>
    %c5 = arith.constant 5 : index
    %c0_5 = arith.constant 0 : index
    %8 = vector.load %arg6[%c5, %c0_5] : memref<8x128xf32, #tpu.memory_space<vmem>>, vector<1x128xf32>
    %c6 = arith.constant 6 : index
    %c0_6 = arith.constant 0 : index
    %9 = vector.load %arg6[%c6, %c0_6] : memref<8x128xf32, #tpu.memory_space<vmem>>, vector<1x128xf32>
    %c7 = arith.constant 7 : index
    %c0_7 = arith.constant 0 : index
    %10 = vector.load %arg6[%c7, %c0_7] : memref<8x128xf32, #tpu.memory_space<vmem>>, vector<1x128xf32>
    %c0_8 = arith.constant 0 : index
    %c0_9 = arith.constant 0 : index
    %11 = vector.load %arg1[%c0_8, %c0_9] : memref<1x128xf32, #tpu.memory_space<vmem>>, vector<1x128xf32>
    %c0_i32 = arith.constant 0 : i32
    %12 = arith.index_cast %c0_i32 : i32 to index
    %c0_10 = arith.constant 0 : index
    %13 = vector.load %arg0[%12, %c0_10] : memref<1x128xf32, #tpu.memory_space<vmem>>, vector<1x128xf32>
    %14 = arith.truncf %13 : vector<1x128xf32> to vector<1x128xbf16>
    %15 = arith.truncf %11 : vector<1x128xf32> to vector<1x128xbf16>
    %16 = tpu.concatenate %14, %15 in 1 : vector<1x128xbf16>, vector<1x128xbf16> -> vector<1x256xbf16>
    %c0_11 = arith.constant 0 : index
    %c0_12 = arith.constant 0 : index
    %17 = vector.load %arg3[%c0_11, %c0_12] : memref<256x512xbf16, #tpu.memory_space<vmem>>, vector<256x512xbf16>
    %cst = arith.constant dense<0.000000e+00> : vector<1x512xf32>
    %18 = tpu.matmul %16, %17, %cst {dimension_numbers = #tpu.dot_dimension_numbers<[1], [0], [0], [1], [0, 0, 1, 1], [], []>} : vector<1x256xbf16>, vector<256x512xbf16>, vector<1x512xf32> -> vector<1x512xf32>
    %19 = vector.extract_strided_slice %18 {offsets = [0, 0], sizes = [1, 128], strides = [1, 1]} : vector<1x512xf32> to vector<1x128xf32>
    %20 = arith.addf %19, %3 : vector<1x128xf32>
    %21 = vector.extract_strided_slice %18 {offsets = [0, 128], sizes = [1, 128], strides = [1, 1]} : vector<1x512xf32> to vector<1x128xf32>
    %22 = arith.addf %21, %8 : vector<1x128xf32>
    %23 = vector.extract_strided_slice %18 {offsets = [0, 256], sizes = [1, 128], strides = [1, 1]} : vector<1x512xf32> to vector<1x128xf32>
    %24 = arith.addf %23, %9 : vector<1x128xf32>
    %25 = vector.extract_strided_slice %18 {offsets = [0, 384], sizes = [1, 128], strides = [1, 1]} : vector<1x512xf32> to vector<1x128xf32>
    %26 = arith.addf %25, %10 : vector<1x128xf32>
    %cst_13 = arith.constant -1.000000e+30 : f32
    %27 = vector.broadcast %cst_13 : f32 to vector<1x128xf32>
    %28 = arith.select %2, %20, %27 : vector<1x128xi1>, vector<1x128xf32>
    %cst_14 = arith.constant dense<0xFF800000> : vector<1xf32>
    %29 = vector.multi_reduction <maximumf>, %28, %cst_14 [1] : vector<1x128xf32> to vector<1xf32>
    %30 = vector.shape_cast %29 : vector<1xf32> to vector<1x1xf32>
    %31 = vector.broadcast %30 : vector<1x1xf32> to vector<1x128xf32>
    %32 = arith.subf %28, %31 : vector<1x128xf32>
    %33 = math.exp %32 : vector<1x128xf32>
    %cst_15 = arith.constant dense<0.000000e+00> : vector<1xf32>
    %34 = vector.multi_reduction <add>, %33, %cst_15 [1] : vector<1x128xf32> to vector<1xf32>
    %35 = vector.shape_cast %34 : vector<1xf32> to vector<1x1xf32>
    %36 = tpu.reciprocal %35 {approx = true} : vector<1x1xf32> -> vector<1x1xf32>
    %37 = vector.broadcast %36 : vector<1x1xf32> to vector<1x128xf32>
    %38 = arith.mulf %33, %37 : vector<1x128xf32>
    %39 = arith.truncf %38 : vector<1x128xf32> to vector<1x128xbf16>
    %c0_16 = arith.constant 0 : index
    %c0_17 = arith.constant 0 : index
    %40 = vector.load %arg2[%c0_16, %c0_17] : memref<128x128xbf16, #tpu.memory_space<vmem>>, vector<128x128xbf16>
    %cst_18 = arith.constant dense<0.000000e+00> : vector<1x128xf32>
    %41 = tpu.matmul %39, %40, %cst_18 {dimension_numbers = #tpu.dot_dimension_numbers<[1], [0], [0], [1], [0, 0, 1, 1], [], []>} : vector<1x128xbf16>, vector<128x128xbf16>, vector<1x128xf32> -> vector<1x128xf32>
    %42 = arith.truncf %41 : vector<1x128xf32> to vector<1x128xbf16>
    %43 = tpu.concatenate %14, %42 in 1 : vector<1x128xbf16>, vector<1x128xbf16> -> vector<1x256xbf16>
    %c0_19 = arith.constant 0 : index
    %c0_20 = arith.constant 0 : index
    %44 = vector.load %arg4[%c0_19, %c0_20] : memref<256x128xbf16, #tpu.memory_space<vmem>>, vector<256x128xbf16>
    %cst_21 = arith.constant dense<0.000000e+00> : vector<1x128xf32>
    %45 = tpu.matmul %43, %44, %cst_21 {dimension_numbers = #tpu.dot_dimension_numbers<[1], [0], [0], [1], [0, 0, 1, 1], [], []>} : vector<1x256xbf16>, vector<256x128xbf16>, vector<1x128xf32> -> vector<1x128xf32>
    %46 = arith.addf %45, %4 : vector<1x128xf32>
    %cst_22 = arith.constant 0.000000e+00 : f32
    %47 = vector.broadcast %cst_22 : f32 to vector<1x128xf32>
    %48 = arith.maximumf %46, %47 : vector<1x128xf32>
    %49 = arith.truncf %48 : vector<1x128xf32> to vector<1x128xbf16>
    %c0_23 = arith.constant 0 : index
    %c0_24 = arith.constant 0 : index
    %50 = vector.load %arg5[%c0_23, %c0_24] : memref<128x384xbf16, #tpu.memory_space<vmem>>, vector<128x384xbf16>
    %cst_25 = arith.constant dense<0.000000e+00> : vector<1x384xf32>
    %51 = tpu.matmul %49, %50, %cst_25 {dimension_numbers = #tpu.dot_dimension_numbers<[1], [0], [0], [1], [0, 0, 1, 1], [], []>} : vector<1x128xbf16>, vector<128x384xbf16>, vector<1x384xf32> -> vector<1x384xf32>
    %52 = vector.extract_strided_slice %51 {offsets = [0, 0], sizes = [1, 128], strides = [1, 1]} : vector<1x384xf32> to vector<1x128xf32>
    %53 = arith.addf %52, %5 : vector<1x128xf32>
    %54 = arith.addf %53, %22 : vector<1x128xf32>
    %55 = arith.negf %54 : vector<1x128xf32>
    %56 = math.exp %55 : vector<1x128xf32>
    %cst_26 = arith.constant 1.000000e+00 : f32
    %57 = vector.broadcast %cst_26 : f32 to vector<1x128xf32>
    %58 = arith.addf %57, %56 : vector<1x128xf32>
    %59 = arith.divf %57, %58 : vector<1x128xf32>
    %60 = vector.extract_strided_slice %51 {offsets = [0, 128], sizes = [1, 128], strides = [1, 1]} : vector<1x384xf32> to vector<1x128xf32>
    %61 = arith.addf %60, %6 : vector<1x128xf32>
    %62 = arith.addf %61, %24 : vector<1x128xf32>
    %63 = arith.negf %62 : vector<1x128xf32>
    %64 = math.exp %63 : vector<1x128xf32>
    %cst_27 = arith.constant 1.000000e+00 : f32
    %65 = vector.broadcast %cst_27 : f32 to vector<1x128xf32>
    %66 = arith.addf %65, %64 : vector<1x128xf32>
    %67 = arith.divf %65, %66 : vector<1x128xf32>
    %68 = vector.extract_strided_slice %51 {offsets = [0, 256], sizes = [1, 128], strides = [1, 1]} : vector<1x384xf32> to vector<1x128xf32>
    %69 = arith.addf %68, %7 : vector<1x128xf32>
    %70 = arith.mulf %59, %26 : vector<1x128xf32>
    %71 = arith.addf %69, %70 : vector<1x128xf32>
    %72 = math.tanh %71 : vector<1x128xf32>
    %cst_28 = arith.constant 1.000000e+00 : f32
    %73 = vector.broadcast %cst_28 : f32 to vector<1x128xf32>
    %74 = arith.subf %73, %67 : vector<1x128xf32>
    %75 = arith.mulf %74, %72 : vector<1x128xf32>
    %76 = arith.mulf %67, %11 : vector<1x128xf32>
    %77 = arith.addf %75, %76 : vector<1x128xf32>
    %78 = arith.index_cast %c0_i32 : i32 to index
    %c0_29 = arith.constant 0 : index
    %79 = vector.load %arg7[%78, %c0_29] : memref<1x128xf32, #tpu.memory_space<vmem>>, vector<1x128xf32>
    tpu.vector_store %arg7[%78, %c0_29], %77 {strides = array<i32>} : memref<1x128xf32, #tpu.memory_space<vmem>>, vector<1x128xf32>,
    %80 = arith.index_cast %c0_i32 : i32 to index
    %c0_30 = arith.constant 0 : index
    %81 = vector.load %arg8[%80, %c0_30] : memref<1x128xf32, #tpu.memory_space<vmem>>, vector<1x128xf32>
    tpu.vector_store %arg8[%80, %c0_30], %38 {strides = array<i32>} : memref<1x128xf32, #tpu.memory_space<vmem>>, vector<1x128xf32>,
    %c1_i32 = arith.constant 1 : i32
    return
  }
}

</mosaic_0001>

<bundles_post_ra>
// kernel: decode_fused.1
= control target key start
LH: loop header
LB: loop body
LE: loop exit
PB: predicated region body
PF: predicated region fallthrough
CT: control target
= control target key end

     0   :  { %14 = vsyncpa [#allocation3], 0  ;;  %s1872_s0 = inlined_call_operand.vmem [shape: f32[1,128], index: 0, kind: input, shape index: {}]   ;;  %s1873_s1 = inlined_call_operand.vmem [shape: f32[1,128], index: 1, kind: input, shape index: {}]   ;;  %s1874_s2 = inlined_call_operand.vmem [shape: bf16[128,128], index: 2, kind: input, shape index: {}]   ;;  %s1875_s3 = inlined_call_operand.hbm [shape: bf16[256,512], index: 3, kind: input, shape index: {}]   ;;  %s1876_s4 = inlined_call_operand.hbm [shape: bf16[256,128], index: 4, kind: input, shape index: {}]   ;;  %s1877_s5 = inlined_call_operand.vmem [shape: bf16[128,384], index: 5, kind: input, shape index: {}]   ;;  %s1878_s6 = inlined_call_operand.vmem [shape: f32[8,128], index: 6, kind: input, shape index: {}]   ;;  %s1879_s7 = inlined_call_operand.hbm [shape: f32[1,128], index: 7, kind: output, shape index: {0}]   ;;  %s1880_s8 = inlined_call_operand.hbm [shape: f32[1,128], index: 8, kind: output, shape index: {1}]  }
   0x1   :  { %15 = vsyncpa [#allocation6], 0 }
   0x2   :  { %16 = vsyncpa [#allocation4], 0 }
   0x3   :  { %17 = vsyncpa [#allocation9], 0  ;;  %s1597_s27 = smov [#allocation2]   ;;  %s1501_s9 = scalar_lea.hbm %s1875_s3, 8192 }
   0x4   :  { %s29_s28 = sshll.u32 %s1597_s27, 4  ;;  %p1502_p0 = scmp.ne.s32.totalorder %s1875_s3, %s1501_s9  ;;  %s30_s28 = int_to_ptr.vmem [resolvable:$true] %s29_s28 }
   0x5   :  { %p1505_p1 = scmp.lt.u32.totalorder %s1501_s9, %s1875_s3 }
   0x7   :  { %p1507_p2 = pnand %p1505_p1, %p1502_p0 }
   0x9   :  { %1510 = shalt.err (!%p1507_p2)
}
   0xa   :  { %s1511_s14 = scalar_lea.vmem %s30_s28, 8192  ;;  %p1516_p4 = scmp.lt.s32.totalorder %s30_s28, %s30_s28 }
   0xb   :  { %p1512_p3 = scmp.ne.s32.totalorder %s30_s28, %s1511_s14  ;;  %p1517_p5 = scmp.lt.s32.totalorder %s1511_s14, %s1511_s14 }
   0xd   :  { %p1518_p6 = por %p1517_p5, %p1516_p4 }
   0xf   :  { %p1519_p7 = pnand %p1518_p6, %p1512_p3 }
  0x11   :  { %1522 = shalt.err (!%p1519_p7)
}
  0x12   :  { %s1598_s15 = smov 256   ;;  %s1599_s16 = smov 16  }
  0x13   :  { %35 = dma.hbm_to_vmem [thread:$0]  %s1875_s3, 8192, %s30_s28, [#allocation3], %s1598_s15, %s1598_s15, %s1599_s16  }
  0x14   :  { %s1600_s19 = smov [#allocation5]   ;;  %s1523_s23 = scalar_lea.hbm %s1876_s4, 2048 }
  0x15   :  { %s41_s20 = sshll.u32 %s1600_s19, 4  ;;  %p1524_p8 = scmp.ne.s32.totalorder %s1876_s4, %s1523_s23  ;;  %s42_s20 = int_to_ptr.vmem [resolvable:$true] %s41_s20 }
  0x16   :  { %p1527_p9 = scmp.lt.u32.totalorder %s1523_s23, %s1876_s4 }
  0x18   :  { %p1529_p10 = pnand %p1527_p9, %p1524_p8 }
  0x1a   :  { %1532 = shalt.err (!%p1529_p10)
}
  0x1b   :  { %s1533_s29 = scalar_lea.vmem %s42_s20, 2048  ;;  %p1538_p12 = scmp.lt.s32.totalorder %s42_s20, %s42_s20 }
  0x1c   :  { %p1534_p11 = scmp.ne.s32.totalorder %s42_s20, %s1533_s29  ;;  %p1539_p13 = scmp.lt.s32.totalorder %s1533_s29, %s1533_s29 }
  0x1e   :  { %p1540_p0 = por %p1539_p13, %p1538_p12 }
  0x20   :  { %p1541_p1 = pnand %p1540_p0, %p1534_p11 }
  0x22   :  { %1544 = shalt.err (!%p1541_p1)
}
  0x23   :  { %s1601_s3 = smov 64   ;;  %s1602_s28 = smov 4  }
  0x24   :  { %47 = dma.hbm_to_vmem [thread:$0]  %s1876_s4, 2048, %s42_s20, [#allocation6], %s1601_s3, %s1601_s3, %s1602_s28  }
  0x25   :  { %1589 = dma.done.wait [#allocation3], 8192  }
  0x26   :  { %1590 = vsyncadd [#allocation3], 4294959104 }
  0x27   :  { %1591 = dma.done.wait [#allocation6], 2048  }
  0x28   :  { %1592 = vsyncadd [#allocation6], 4294965248  ;;  %v1335_v0 = vld [vmem:[#allocation2 + $0x4] ss:$16 sps:$4 sm:$0xff]   ;;  %v1337_v1 = vld [vmem:[#allocation2] ss:$16 sps:$4 sm:$0xff]   ;;  %v59_v36 = vlaneseq }
  0x29   :  { %458 = vmatprep.subr.bf16.mxu0 %v1335_v0  ;;  %v1338_v2 = vld [vmem:[#allocation2 + $0x24] ss:$16 sps:$4 sm:$0xff]   ;;  %v1340_v3 = vld [vmem:[#allocation2 + $0x20] ss:$16 sps:$4 sm:$0xff]   ;;  %vm545_vm1 = vcmask 1040384   ;;  %v1603_v47 = vmov 0.0  }
  0x2a   :  { %459 = vmatpush1.bf16.msra.mxu0 %v1337_v1  ;;  %v1341_v4 = vld [vmem:[#allocation2 + $0x44] ss:$16 sps:$4 sm:$0xff]   ;;  %v1343_v5 = vld [vmem:[#allocation2 + $0x40] ss:$16 sps:$4 sm:$0xff]   ;;  %v60_v37 = vand.u32 127, %v59_v36  ;;  %v1384_v48 = vld [vmem:[%s1874_s2 + $0x8] sm:$0xff]  }
  0x2b   :  { %460 = vmatprep.subr.bf16.mxu0 %v1338_v2  ;;  %v1344_v6 = vld [vmem:[#allocation2 + $0x64] ss:$16 sps:$4 sm:$0xff]   ;;  %v1346_v7 = vld [vmem:[#allocation2 + $0x60] ss:$16 sps:$4 sm:$0xff]   ;;  %v1386_v50 = vld [vmem:[%s1874_s2 + $0x18] sm:$0xff]   ;;  %vm1604_vm2 = vmmov 0  }
  0x2c   :  { %v1347_v8 = vld [vmem:[#allocation2 + $0x84] ss:$16 sps:$4 sm:$0xff]   ;;  %v1349_v9 = vld [vmem:[#allocation2 + $0x80] ss:$16 sps:$4 sm:$0xff]   ;;  %vm61_vm0 = vcmp.lt.s32.totalorder %v60_v37, 16  ;;  %v1388_v57 = vld [vmem:[%s1874_s2 + $0x28] sm:$0xff]  }
  0x2d   :  { %v1350_v10 = vld [vmem:[#allocation2 + $0xa4] ss:$16 sps:$4 sm:$0xff]   ;;  %v1352_v11 = vld [vmem:[#allocation2 + $0xa0] ss:$16 sps:$4 sm:$0xff]   ;;  %v1390_v59 = vld [vmem:[%s1874_s2 + $0x38] sm:$0xff]  }
  0x2e   :  { %461 = vmatpush1.bf16.msra.mxu0 %v1340_v3  ;;  %v1353_v12 = vld [vmem:[#allocation2 + $0xc4] ss:$16 sps:$4 sm:$0xff]   ;;  %v1355_v13 = vld [vmem:[#allocation2 + $0xc0] ss:$16 sps:$4 sm:$0xff]   ;;  %v1391_v60 = vld [vmem:[#allocation2 + $0xc] ss:$16 sps:$4 sm:$0xff]  }
  0x2f   :  { %462 = vmatprep.subr.bf16.mxu0 %v1341_v4  ;;  %v1680_v14 = vld [vmem:[%s1873_s1] sm:$0x1]  ;;  %v1356_v15 = vld [vmem:[#allocation2 + $0xe4] ss:$16 sps:$4 sm:$0xff]   ;;  %v1393_v61 = vld [vmem:[#allocation2 + $0x8] ss:$16 sps:$4 sm:$0xff]   ;;  %499 = vmatprep.subr.bf16.mxu1 %v1391_v60 }
  0x30   :  { %v73_v16 = vpack.c.bf16 %v1680_v14, %v1680_v14  ;;  %v1358_v17 = vld [vmem:[#allocation2 + $0xe0] ss:$16 sps:$4 sm:$0xff]   ;;  %v1359_v18 = vld [vmem:[#allocation2 + $0x104] ss:$16 sps:$4 sm:$0xff]   ;;  %v1394_v62 = vld [vmem:[#allocation2 + $0x2c] ss:$16 sps:$4 sm:$0xff]   ;;  %500 = vmatpush1.bf16.msra.mxu1 %v1393_v61 }
  0x31   :  { %v1361_v19 = vld [vmem:[#allocation2 + $0x100] ss:$16 sps:$4 sm:$0xff]   ;;  %v1362_v20 = vld [vmem:[#allocation2 + $0x124] ss:$16 sps:$4 sm:$0xff]   ;;  %v1396_v63 = vld [vmem:[#allocation2 + $0x28] ss:$16 sps:$4 sm:$0xff]   ;;  %501 = vmatprep.subr.bf16.mxu1 %v1394_v62 }
  0x32   :  { %463 = vmatpush1.bf16.msra.mxu0 %v1343_v5  ;;  %490 = vmatprep.mubr.bf16.mxu0 %v73_v16  ;;  %v1364_v21 = vld [vmem:[#allocation2 + $0x120] ss:$16 sps:$4 sm:$0xff]   ;;  %v1365_v22 = vld [vmem:[#allocation2 + $0x144] ss:$16 sps:$4 sm:$0xff]   ;;  %v1397_v0 = vld [vmem:[#allocation2 + $0x4c] ss:$16 sps:$4 sm:$0xff]  }
  0x33   :  { %464 = vmatprep.subr.bf16.mxu0 %v1344_v6  ;;  %531 = vmatprep.mubr.bf16.mxu1 %v73_v16  ;;  %v1367_v23 = vld [vmem:[#allocation2 + $0x140] ss:$16 sps:$4 sm:$0xff]   ;;  %v1368_v24 = vld [vmem:[#allocation2 + $0x164] ss:$16 sps:$4 sm:$0xff]   ;;  %v1399_v1 = vld [vmem:[#allocation2 + $0x48] ss:$16 sps:$4 sm:$0xff]  }
  0x34   :  { %v1370_v25 = vld [vmem:[#allocation2 + $0x160] ss:$16 sps:$4 sm:$0xff]   ;;  %v1371_v26 = vld [vmem:[#allocation2 + $0x184] ss:$16 sps:$4 sm:$0xff]   ;;  %502 = vmatpush1.bf16.msra.mxu1 %v1396_v63  ;;  %v1400_v2 = vld [vmem:[#allocation2 + $0x6c] ss:$16 sps:$4 sm:$0xff]  }
  0x35   :  { %v1373_v27 = vld [vmem:[#allocation2 + $0x180] ss:$16 sps:$4 sm:$0xff]   ;;  %v1374_v28 = vld [vmem:[#allocation2 + $0x1a4] ss:$16 sps:$4 sm:$0xff]   ;;  %503 = vmatprep.subr.bf16.mxu1 %v1397_v0  ;;  %v1402_v3 = vld [vmem:[#allocation2 + $0x68] ss:$16 sps:$4 sm:$0xff]  }
  0x36   :  { %465 = vmatpush1.bf16.msra.mxu0 %v1346_v7  ;;  %v1376_v29 = vld [vmem:[#allocation2 + $0x1a0] ss:$16 sps:$4 sm:$0xff]   ;;  %v1377_v30 = vld [vmem:[#allocation2 + $0x1c4] ss:$16 sps:$4 sm:$0xff]   ;;  %v1403_v4 = vld [vmem:[#allocation2 + $0x8c] ss:$16 sps:$4 sm:$0xff]  }
  0x37   :  { %466 = vmatprep.subr.bf16.mxu0 %v1347_v8  ;;  %v1379_v31 = vld [vmem:[#allocation2 + $0x1c0] ss:$16 sps:$4 sm:$0xff]   ;;  %v1380_v32 = vld [vmem:[#allocation2 + $0x1e4] ss:$16 sps:$4 sm:$0xff]   ;;  %v1405_v5 = vld [vmem:[#allocation2 + $0x88] ss:$16 sps:$4 sm:$0xff]  }
  0x38   :  { %v1382_v33 = vld [vmem:[#allocation2 + $0x1e0] ss:$16 sps:$4 sm:$0xff]   ;;  %504 = vmatpush1.bf16.msra.mxu1 %v1399_v1  ;;  %v1406_v6 = vld [vmem:[#allocation2 + $0xac] ss:$16 sps:$4 sm:$0xff]   ;;  %v1408_v7 = vld [vmem:[#allocation2 + $0xa8] ss:$16 sps:$4 sm:$0xff]  }
  0x39   :  { %v71_v34 = vld [vmem:[%s1872_s0] sm:$0x1]  ;;  %v1385_v49 = vld [vmem:[%s1874_s2 + $0x10] sm:$0xff]   ;;  %505 = vmatprep.subr.bf16.mxu1 %v1400_v2  ;;  %v1409_v8 = vld [vmem:[#allocation2 + $0xcc] ss:$16 sps:$4 sm:$0xff]  }
  0x3a   :  { %467 = vmatpush1.bf16.msra.mxu0 %v1349_v9  ;;  %v1687_v35 = vpack.c.bf16 %v71_v34, %v71_v34  ;;  %v62_v38 = vld [vmem:[%s1878_s6] sm:$0x1]  ;;  %v1389_v58 = vld [vmem:[%s1874_s2 + $0x30] sm:$0xff]   ;;  %v1411_v9 = vld [vmem:[#allocation2 + $0xc8] ss:$16 sps:$4 sm:$0xff]  }
  0x3b   :  { %468 = vmatprep.subr.bf16.mxu0 %v1350_v10  ;;  %v1383_v46 = vld [vmem:[%s1874_s2] sm:$0xff]   ;;  %v1412_v10 = vld [vmem:[#allocation2 + $0xec] ss:$16 sps:$4 sm:$0xff]   ;;  %v1420_v16 = vld [vmem:[#allocation2 + $0x128] ss:$16 sps:$4 sm:$0xff]  }
  0x3c   :  { %v1387_v56 = vld [vmem:[%s1874_s2 + $0x20] sm:$0xff]   ;;  %506 = vmatpush1.bf16.msra.mxu1 %v1402_v3  ;;  %v1444_v34 = vld [vmem:[#allocation5 + $0x10] sm:$0xff]   ;;  %v1445_v36 = vld [vmem:[#allocation5 + $0x58] sm:$0xff]  }
  0x3d   :  { %507 = vmatprep.subr.bf16.mxu1 %v1403_v4  ;;  %v1446_v37 = vld [vmem:[#allocation5 + $0x18] sm:$0xff]   ;;  %v1473_v60 = vld [vmem:[%s1877_s5 + $0x64] ss:$12 sps:$4 sm:$0xff]   ;;  %v1471_v61 = vld [vmem:[%s1877_s5 + $0x60] ss:$12 sps:$4 sm:$0xff]  }
  0x3e   :  { %469 = vmatpush1.bf16.msra.mxu0 %v1352_v11  ;;  %v1414_v11 = vld [vmem:[#allocation2 + $0xe8] ss:$16 sps:$4 sm:$0xff]  }
  0x3f   :  { %470 = vmatprep.subr.bf16.mxu0 %v1353_v12  ;;  %v1415_v12 = vld [vmem:[#allocation2 + $0x10c] ss:$16 sps:$4 sm:$0xff]   ;;  %v1475_v63 = vld [vmem:[%s1877_s5 + $0x78] ss:$12 sps:$4 sm:$0xff]  }
  0x40   :  { %508 = vmatpush1.bf16.msra.mxu1 %v1405_v5  ;;  %v1477_v62 = vld [vmem:[%s1877_s5 + $0x7c] ss:$12 sps:$4 sm:$0xff]  }
  0x41   :  { %509 = vmatprep.subr.bf16.mxu1 %v1406_v6 }
  0x42   :  { %471 = vmatpush1.bf16.msra.mxu0 %v1355_v13  ;;  %v1417_v13 = vld [vmem:[#allocation2 + $0x108] ss:$16 sps:$4 sm:$0xff]  }
  0x43   :  { %472 = vmatprep.subr.bf16.mxu0 %v1356_v15  ;;  %v1418_v15 = vld [vmem:[#allocation2 + $0x12c] ss:$16 sps:$4 sm:$0xff]  }
  0x44   :  { %510 = vmatpush1.bf16.msra.mxu1 %v1408_v7  ;;  %v1458_v7 = vld [vmem:[%s1877_s5 + $0x8] ss:$12 sps:$4 sm:$0xff]  }
  0x45   :  { %511 = vmatprep.subr.bf16.mxu1 %v1409_v8 }
  0x46   :  { %473 = vmatpush1.bf16.msra.mxu0 %v1358_v17  ;;  %v1421_v17 = vld [vmem:[#allocation2 + $0x14c] ss:$16 sps:$4 sm:$0xff]  }
  0x47   :  { %474 = vmatprep.subr.bf16.mxu0 %v1359_v18  ;;  %v1423_v18 = vld [vmem:[#allocation2 + $0x148] ss:$16 sps:$4 sm:$0xff]  }
  0x48   :  { %512 = vmatpush1.bf16.msra.mxu1 %v1411_v9 }
  0x49   :  { %513 = vmatprep.subr.bf16.mxu1 %v1412_v10  ;;  %v1462_v10 = vld [vmem:[%s1877_s5 + $0x20] ss:$12 sps:$4 sm:$0xff]  }
  0x4a   :  { %475 = vmatpush1.bf16.msra.mxu0 %v1361_v19  ;;  %v1424_v19 = vld [vmem:[#allocation2 + $0x16c] ss:$16 sps:$4 sm:$0xff]  }
  0x4b   :  { %476 = vmatprep.subr.bf16.mxu0 %v1362_v20  ;;  %v1426_v20 = vld [vmem:[#allocation2 + $0x168] ss:$16 sps:$4 sm:$0xff]  }
  0x4c   :  { %514 = vmatpush1.bf16.msra.mxu1 %v1414_v11  ;;  %v1466_v11 = vld [vmem:[%s1877_s5 + $0x38] ss:$12 sps:$4 sm:$0xff]  }
  0x4d   :  { %515 = vmatprep.subr.bf16.mxu1 %v1415_v12  ;;  %v1474_v12 = vld [vmem:[%s1877_s5 + $0x68] ss:$12 sps:$4 sm:$0xff]  }
  0x4e   :  { %477 = vmatpush1.bf16.msra.mxu0 %v1364_v21  ;;  %v1427_v21 = vld [vmem:[#allocation2 + $0x18c] ss:$16 sps:$4 sm:$0xff]  }
  0x4f   :  { %478 = vmatprep.subr.bf16.mxu0 %v1365_v22  ;;  %v1429_v22 = vld [vmem:[#allocation2 + $0x188] ss:$16 sps:$4 sm:$0xff]  }
  0x50   :  { %516 = vmatpush1.bf16.msra.mxu1 %v1417_v13  ;;  %v1478_v13 = vld [vmem:[%s1877_s5 + $0x80] ss:$12 sps:$4 sm:$0xff]  }
  0x51   :  { %517 = vmatprep.subr.bf16.mxu1 %v1418_v15  ;;  %v1481_v15 = vld [vmem:[%s1877_s5 + $0x94] ss:$12 sps:$4 sm:$0xff]  }
  0x52   :  { %479 = vmatpush1.bf16.msra.mxu0 %v1367_v23  ;;  %v1430_v23 = vld [vmem:[#allocation2 + $0x1ac] ss:$16 sps:$4 sm:$0xff]  }
  0x53   :  { %480 = vmatprep.subr.bf16.mxu0 %v1368_v24  ;;  %v1432_v24 = vld [vmem:[#allocation2 + $0x1a8] ss:$16 sps:$4 sm:$0xff]  }
  0x54   :  { %518 = vmatpush1.bf16.msra.mxu1 %v1420_v16  ;;  %v1479_v16 = vld [vmem:[%s1877_s5 + $0x90] ss:$12 sps:$4 sm:$0xff]  }
  0x55   :  { %519 = vmatprep.subr.bf16.mxu1 %v1421_v17  ;;  %v1482_v17 = vld [vmem:[%s1877_s5 + $0x98] ss:$12 sps:$4 sm:$0xff]  }
  0x56   :  { %481 = vmatpush1.bf16.msra.mxu0 %v1370_v25  ;;  %v1433_v25 = vld [vmem:[#allocation2 + $0x1cc] ss:$16 sps:$4 sm:$0xff]  }
  0x57   :  { %482 = vmatprep.subr.bf16.mxu0 %v1371_v26  ;;  %v1435_v26 = vld [vmem:[#allocation2 + $0x1c8] ss:$16 sps:$4 sm:$0xff]  }
  0x58   :  { %520 = vmatpush1.bf16.msra.mxu1 %v1423_v18  ;;  %v1485_v18 = vld [vmem:[%s1877_s5 + $0xac] ss:$12 sps:$4 sm:$0xff]  }
  0x59   :  { %521 = vmatprep.subr.bf16.mxu1 %v1424_v19  ;;  %v1483_v19 = vld [vmem:[%s1877_s5 + $0xa8] ss:$12 sps:$4 sm:$0xff]  }
  0x5a   :  { %483 = vmatpush1.bf16.msra.mxu0 %v1373_v27  ;;  %v1436_v27 = vld [vmem:[#allocation2 + $0x1ec] ss:$16 sps:$4 sm:$0xff]  }
  0x5b   :  { %484 = vmatprep.subr.bf16.mxu0 %v1374_v28  ;;  %v1438_v28 = vld [vmem:[#allocation2 + $0x1e8] ss:$16 sps:$4 sm:$0xff]  }
  0x5c   :  { %522 = vmatpush1.bf16.msra.mxu1 %v1426_v20  ;;  %v1486_v20 = vld [vmem:[%s1877_s5 + $0xb0] ss:$12 sps:$4 sm:$0xff]  }
  0x5d   :  { %523 = vmatprep.subr.bf16.mxu1 %v1427_v21  ;;  %v1605_v21 = vmov 0  }
  0x5e   :  { %485 = vmatpush1.bf16.msra.mxu0 %v1376_v29  ;;  %v1439_v29 = vld [vmem:[#allocation5 + $0x40] sm:$0xff]  }
  0x5f   :  { %486 = vmatprep.subr.bf16.mxu0 %v1377_v30  ;;  %v1440_v30 = vld [vmem:[#allocation5] sm:$0xff]  }
  0x60   :  { %524 = vmatpush1.bf16.msra.mxu1 %v1429_v22 }
  0x61   :  { %525 = vmatprep.subr.bf16.mxu1 %v1430_v23  ;;  %v63_v23 = vld [vmem:[%s1878_s6 + $0x1] sm:$0x1] }
  0x62   :  { %487 = vmatpush1.bf16.msra.mxu0 %v1379_v31  ;;  %v1441_v31 = vld [vmem:[#allocation5 + $0x48] sm:$0xff]  }
  0x63   :  { %488 = vmatprep.subr.bf16.mxu0 %v1380_v32  ;;  %v1442_v32 = vld [vmem:[#allocation5 + $0x8] sm:$0xff]  }
  0x64   :  { %526 = vmatpush1.bf16.msra.mxu1 %v1432_v24 }
  0x65   :  { %527 = vmatprep.subr.bf16.mxu1 %v1433_v25 }
  0x66   :  { %489 = vmatpush1.bf16.msra.mxu0 %v1382_v33  ;;  %v1443_v33 = vld [vmem:[#allocation5 + $0x50] sm:$0xff]  }
  0x67   :  { %1284 = vmatprep.subr.bf16.mxu0 %v1603_v47 }
  0x68   :  { %528 = vmatpush1.bf16.msra.mxu1 %v1435_v26 }
  0x69   :  { %491 = vmatmul.mubr.bf16.vlgmr.msra.gmra.mrb[0].mxu0 %v1687_v35  ;;  %529 = vmatprep.subr.bf16.mxu1 %v1436_v27 }
  0x6a   :  { %1285 = vmatpush3.bf16.msra.mxu0 %v1383_v46  ;;  %1300 = vmatprep.mubr.msk.bf16.mxu0 %vm1604_vm2, %v1603_v47 }
  0x6b   :  { %1286 = vmatprep.subr.bf16.mxu0 %v1603_v47 }
  0x6c   :  { %530 = vmatpush1.bf16.msra.mxu1 %v1438_v28 }
  0x6d   :  { %1253 = vmatprep.subr.bf16.mxu1 %v1439_v29 }
  0x6e   :  { %1287 = vmatpush3.bf16.msra.mxu0 %v1384_v48 }
  0x6f   :  { %1288 = vmatprep.subr.bf16.mxu0 %v1603_v47  ;;  %532 = vmatmul.mubr.bf16.vlgmr.msra.gmra.mrb[0].mxu1 %v1687_v35 }
  0x70   :  { %1254 = vmatpush3.bf16.msra.mxu1 %v1440_v30 }
  0x71   :  { %1255 = vmatprep.subr.bf16.mxu1 %v1441_v31 }
  0x72   :  { %1289 = vmatpush3.bf16.msra.mxu0 %v1385_v49 }
  0x73   :  { %1290 = vmatprep.subr.bf16.mxu0 %v1603_v47 }
  0x74   :  { %1256 = vmatpush3.bf16.msra.mxu1 %v1442_v32 }
  0x75   :  { %1257 = vmatprep.subr.bf16.mxu1 %v1443_v33 }
  0x76   :  { %1291 = vmatpush3.bf16.msra.mxu0 %v1386_v50  ;;  %v1453_v50 = vld [vmem:[#allocation5 + $0x78] sm:$0xff]  }
  0x77   :  { %1292 = vmatprep.subr.bf16.mxu0 %v1603_v47 }
  0x78   :  { %1258 = vmatpush3.bf16.msra.mxu1 %v1444_v34 }
  0x79   :  { %1259 = vmatprep.subr.bf16.mxu1 %v1445_v36 }
  0x7a   :  { %1293 = vmatpush3.bf16.msra.mxu0 %v1387_v56  ;;  %v1465_v56 = vld [vmem:[%s1877_s5 + $0x34] ss:$12 sps:$4 sm:$0xff]  }
  0x7b   :  { %1294 = vmatprep.subr.bf16.mxu0 %v1603_v47 }
  0x7c   :  { %1260 = vmatpush3.bf16.msra.mxu1 %v1446_v37 }
  0x7e   :  { %1295 = vmatpush3.bf16.msra.mxu0 %v1388_v57  ;;  %v1463_v57 = vld [vmem:[%s1877_s5 + $0x30] ss:$12 sps:$4 sm:$0xff]  }
  0x7f   :  { %1296 = vmatprep.subr.bf16.mxu0 %v1603_v47 }
  0x82   :  { %1297 = vmatpush3.bf16.msra.mxu0 %v1389_v58  ;;  %v1469_v58 = vld [vmem:[%s1877_s5 + $0x4c] ss:$12 sps:$4 sm:$0xff]  }
  0x83   :  { %1298 = vmatprep.subr.bf16.mxu0 %v1603_v47 }
  0x86   :  { %1299 = vmatpush3.bf16.msra.mxu0 %v1390_v59  ;;  %v1467_v59 = vld [vmem:[%s1877_s5 + $0x48] ss:$12 sps:$4 sm:$0xff]  }
 0x13c   :  { %v492_v39 = vpop.f32.mrb[0].mxu0 }
 0x13d   :  { %v540_v40 = vadd.f32 %v492_v39, %v62_v38  ;;  %v1693_v41 = vpop.f32.mrb[1].mxu0  ;;  %v1447_v38 = vld [vmem:[#allocation5 + $0x60] sm:$0xff]  }
 0x13e   :  { %v496_v42 = vpop.f32.mrb[2].mxu0  ;;  %v1448_v39 = vld [vmem:[#allocation5 + $0x20] sm:$0xff]   ;;  %1261 = vmatprep.subr.bf16.mxu1 %v1447_v38 }
 0x13f   :  { %v497_v43 = vpop.f32.mrb[3].mxu0  ;;  %v544_v44 = vsel %vm61_vm0, %v540_v40, -1e+30  ;;  %v1449_v40 = vld [vmem:[#allocation5 + $0x68] sm:$0xff]   ;;  %1262 = vmatpush3.bf16.msra.mxu1 %v1448_v39 }
 0x140   :  { %v546_v45 = vsel %vm545_vm1, %v544_v44, -inf  ;;  %v1450_v42 = vld [vmem:[#allocation5 + $0x28] sm:$0xff]   ;;  %1263 = vmatprep.subr.bf16.mxu1 %v1449_v40  ;;  %v1451_v43 = vld [vmem:[#allocation5 + $0x70] sm:$0xff]  }
 0x141   :  { %547 = vmax.xlane.f32.xlu0 %v546_v45 }
 0x142   :  { %v1773_v0 = vpop.f32.mrb[0].mxu1 }
 0x143   :  { %1264 = vmatpush3.bf16.msra.mxu1 %v1450_v42  ;;  %v1775_v1 = vpop.f32.mrb[1].mxu1 }
 0x144   :  { %1265 = vmatprep.subr.bf16.mxu1 %v1451_v43  ;;  %v537_v2 = vpop.f32.mrb[2].mxu1 }
 0x145   :  { %v538_v3 = vpop.f32.mrb[3].mxu1 }
 0x1ce   :  { %v548_v51 = vpop.xlane.xlu0 %547 }
 0x1cf   :  { %v549_v52 = vsub.f32 %v544_v44, %v548_v51  ;;  %v1452_v44 = vld [vmem:[#allocation5 + $0x30] sm:$0xff]   ;;  %v1454_v51 = vld [vmem:[#allocation5 + $0x38] sm:$0xff]  }
 0x1d0   :  { %1266 = vmatpush3.bf16.msra.mxu1 %v1452_v44 }
 0x1d1   :  { %v550_v53 = vmul.f32 1.442695, %v549_v52  ;;  %1267 = vmatprep.subr.bf16.mxu1 %v1453_v50  ;;  %v1455_v52 = vld [vmem:[%s1877_s5] ss:$12 sps:$4 sm:$0xff]  }
 0x1d3   :  { %1487 = vpow2.f32 %v550_v53  ;;  %v1457_v53 = vld [vmem:[%s1877_s5 + $0x4] ss:$12 sps:$4 sm:$0xff]  }
 0x1d4   :  { %1268 = vmatpush3.bf16.msra.mxu1 %v1454_v51  ;;  %993 = vmatprep.subr.bf16.mxu0 %v1457_v53 }
 0x1d5   :  { %1304 = vmatprep.subr.bf16.mxu1 %v1603_v47 }
 0x1dd   :  { %v1713_v54 = vpop.eup %1487 }
 0x1de   :  { %v552_v55 = vsel %vm545_vm1, %v1713_v54, 0.0 }
 0x1df   :  { %553 = vadd.xlane.f32.xlu0 %v552_v55  ;;  %v1459_v55 = vld [vmem:[%s1877_s5 + $0x18] ss:$12 sps:$4 sm:$0xff]  }
 0x26c   :  { %v554_v45 = vpop.xlane.xlu0 %553 }
 0x26d   :  { %1489 = vrcp.f32 %v554_v45 }
 0x277   :  { %v1490_v46 = vpop.eup %1489 }
 0x278   :  { %v556_v48 = vmul.f32 %v1490_v46, %v1713_v54  ;;  %v1461_v54 = vld [vmem:[%s1877_s5 + $0x1c] ss:$12 sps:$4 sm:$0xff]  }
 0x27a   :  { %v557_v49 = vpack.c.bf16 %v556_v48, %v556_v48  ;;  %1099 = vst [vmem:[#allocation8] sm:$0x1] %v556_v48 }
 0x27c   :  { %1301 = vmatmul.mubr.bf16.vlgmr.msra.gmra.mrb[4].mxu0 %v557_v49 }
 0x27d   :  { %994 = vmatpush1.bf16.msra.mxu0 %v1455_v52  ;;  %1025 = vmatprep.mubr.bf16.mxu0 %v1605_v21 }
 0x27e   :  { %995 = vmatprep.subr.bf16.mxu0 %v1461_v54 }
 0x281   :  { %996 = vmatpush1.bf16.msra.mxu0 %v1459_v55 }
 0x282   :  { %997 = vmatprep.subr.bf16.mxu0 %v1465_v56 }
 0x285   :  { %998 = vmatpush1.bf16.msra.mxu0 %v1463_v57 }
 0x286   :  { %999 = vmatprep.subr.bf16.mxu0 %v1469_v58 }
 0x289   :  { %1000 = vmatpush1.bf16.msra.mxu0 %v1467_v59 }
 0x28a   :  { %1001 = vmatprep.subr.bf16.mxu0 %v1473_v60 }
 0x28d   :  { %1002 = vmatpush1.bf16.msra.mxu0 %v1471_v61 }
 0x28e   :  { %1003 = vmatprep.subr.bf16.mxu0 %v1477_v62 }
 0x291   :  { %1004 = vmatpush1.bf16.msra.mxu0 %v1475_v63 }
 0x292   :  { %1005 = vmatprep.subr.bf16.mxu0 %v1481_v15 }
 0x295   :  { %1006 = vmatpush1.bf16.msra.mxu0 %v1479_v16 }
 0x296   :  { %1007 = vmatprep.subr.bf16.mxu0 %v1485_v18 }
 0x299   :  { %1008 = vmatpush1.bf16.msra.mxu0 %v1483_v19 }
 0x34f   :  { %v656_v4 = vpop.f32.mrb[4].mxu0 }
 0x350   :  { %v662_v5 = vpack.c.bf16 %v656_v4, %v656_v4  ;;  %v1302_v6 = vpop.f32.mrb[5].mxu0 }
 0x351   :  { %v659_v8 = vpop.f32.mrb[6].mxu0 }
 0x352   :  { %v1303_v9 = vpop.f32.mrb[7].mxu0  ;;  %823 = vmatprep.mubr.bf16.mxu1 %v662_v5 }
 0x353   :  { %824 = vmatmul.mubr.bf16.vlgmr.msra.gmra.mrb[4].mxu1 %v1687_v35  ;;  %v1470_v35 = vld [vmem:[%s1877_s5 + $0x50] ss:$12 sps:$4 sm:$0xff]   ;;  %s1606_s5 = smov [#allocation8]  }
 0x354   :  { %1305 = vmatpush3.bf16.msra.mxu1 %v1458_v7  ;;  %1320 = vmatprep.mubr.msk.bf16.mxu1 %vm1604_vm2, %v1603_v47  ;;  %s1116_s25 = sshll.u32 %s1606_s5, 4  ;;  %s1117_s25 = int_to_ptr.vmem [resolvable:$true] %s1116_s25 }
 0x355   :  { %1306 = vmatprep.subr.bf16.mxu1 %v1603_v47  ;;  %s1545_s26 = scalar_lea.vmem %s1117_s25, 16  ;;  %s1549_s27 = scalar_lea.vmem %s1117_s25, 32 }
 0x356   :  { %p1546_p2 = scmp.ne.s32.totalorder %s1117_s25, %s1545_s26  ;;  %p1550_p3 = scmp.lt.s32.totalorder %s1117_s25, %s1117_s25 }
 0x357   :  { %p1551_p4 = scmp.lt.s32.totalorder %s1549_s27, %s1545_s26 }
 0x358   :  { %1307 = vmatpush3.bf16.msra.mxu1 %v1462_v10 }
 0x359   :  { %1308 = vmatprep.subr.bf16.mxu1 %v1603_v47  ;;  %p1552_p5 = por %p1551_p4, %p1550_p3 }
 0x35b   :  { %p1553_p6 = pnand %p1552_p5, %p1546_p2 }
 0x35c   :  { %1309 = vmatpush3.bf16.msra.mxu1 %v1466_v11 }
 0x35d   :  { %1310 = vmatprep.subr.bf16.mxu1 %v1603_v47 }
 0x360   :  { %1311 = vmatpush3.bf16.msra.mxu1 %v1470_v35 }
 0x361   :  { %1312 = vmatprep.subr.bf16.mxu1 %v1603_v47 }
 0x364   :  { %1313 = vmatpush3.bf16.msra.mxu1 %v1474_v12 }
 0x365   :  { %1314 = vmatprep.subr.bf16.mxu1 %v1603_v47 }
 0x368   :  { %1315 = vmatpush3.bf16.msra.mxu1 %v1478_v13 }
 0x369   :  { %1316 = vmatprep.subr.bf16.mxu1 %v1603_v47 }
 0x36c   :  { %1317 = vmatpush3.bf16.msra.mxu1 %v1482_v17 }
 0x36d   :  { %1318 = vmatprep.subr.bf16.mxu1 %v1603_v47 }
 0x370   :  { %1319 = vmatpush3.bf16.msra.mxu1 %v1486_v20 }
 0x426   :  { %v1269_v22 = vpop.f32.mrb[4].mxu1 }
 0x427   :  { %v1270_v24 = vpop.f32.mrb[5].mxu1 }
 0x428   :  { %v1271_v47 = vadd.f32 %v1270_v24, %v1269_v22  ;;  %v1272_v25 = vpop.f32.mrb[6].mxu1 }
 0x429   :  { %v1273_v26 = vpop.f32.mrb[7].mxu1 }
 0x42a   :  { %v826_v27 = vadd.f32 %v1271_v47, %v63_v23 }
 0x42c   :  { %v831_v28 = vmax.f32 %v826_v27, 0.0 }
 0x42e   :  { %v832_v29 = vpack.c.bf16 %v831_v28, %v831_v28 }
 0x430   :  { %1026 = vmatmul.mubr.bf16.vlgmr.msra.gmra.mrb[8].mxu0 %v832_v29  ;;  %1321 = vmatmul.mubr.bf16.vlgmr.msra.gmra.mrb[8].mxu1 %v832_v29 }
 0x431   :  { %1556 = shalt.err (!%p1553_p6)
}
 0x432   :  { %s1557_s3 = scalar_lea.hbm %s1880_s8, 16 }
 0x433   :  { %p1558_p7 = scmp.ne.s32.totalorder %s1880_s8, %s1557_s3  ;;  %p1561_p8 = scmp.lt.u32.totalorder %s1557_s3, %s1880_s8 }
 0x435   :  { %p1563_p9 = pnand %p1561_p8, %p1558_p7 }
 0x437   :  { %1566 = shalt.err (!%p1563_p9)
}
 0x438   :  { %1119 = dma.vmem_to_hbm [thread:$0]  %s1117_s25, 16, %s1880_s8, [#allocation9]   ;;  %v67_v30 = vld [vmem:[%s1878_s6 + $0x5] sm:$0x1]  ;;  %v64_v31 = vld [vmem:[%s1878_s6 + $0x2] sm:$0x1] }
 0x439   :  { %v68_v32 = vld [vmem:[%s1878_s6 + $0x6] sm:$0x1]  ;;  %v65_v33 = vld [vmem:[%s1878_s6 + $0x3] sm:$0x1]  ;;  %v541_v37 = vadd.f32 %v1693_v41, %v67_v30  ;;  %v69_v55 = vld [vmem:[%s1878_s6 + $0x7] sm:$0x1] }
 0x43a   :  { %v542_v42 = vadd.f32 %v1773_v0, %v68_v32  ;;  %v66_v57 = vld [vmem:[%s1878_s6 + $0x4] sm:$0x1]  ;;  %v543_v58 = vadd.f32 %v1775_v1, %v69_v55  ;;  %s1607_s21 = smov [#allocation7]  }
 0x43b   :  { %s1106_s22 = sshll.u32 %s1607_s21, 4  ;;  %s1107_s22 = int_to_ptr.vmem [resolvable:$true] %s1106_s22 }
 0x43c   :  { %s1567_s6 = scalar_lea.vmem %s1107_s22, 16  ;;  %s1571_s23 = scalar_lea.vmem %s1107_s22, 32 }
 0x43d   :  { %p1568_p10 = scmp.ne.s32.totalorder %s1107_s22, %s1567_s6  ;;  %p1572_p11 = scmp.lt.s32.totalorder %s1107_s22, %s1107_s22 }
 0x43e   :  { %p1573_p12 = scmp.lt.s32.totalorder %s1571_s23, %s1567_s6 }
 0x440   :  { %p1574_p13 = por %p1573_p12, %p1572_p11 }
 0x442   :  { %p1575_p0 = pnand %p1574_p13, %p1568_p10 }
 0x503   :  { %v1027_v34 = vpop.f32.mrb[8].mxu0  ;;  %v1068_v36 = vpop.f32.mrb[8].mxu1 }
 0x504   :  { %v1074_v38 = vadd.f32 %v1027_v34, %v64_v31  ;;  %v1029_v39 = vpop.f32.mrb[9].mxu0  ;;  %v1322_v40 = vpop.f32.mrb[9].mxu1  ;;  %v1090_v60 = vadd.f32 %v1068_v36, %v66_v57 }
 0x505   :  { %v1082_v43 = vadd.f32 %v1029_v39, %v65_v33  ;;  %v1031_v44 = vpop.f32.mrb[10].mxu0  ;;  %v1071_v45 = vpop.f32.mrb[10].mxu1 }
 0x506   :  { %v1075_v46 = vadd.f32 %v1074_v38, %v541_v37  ;;  %v1032_v48 = vpop.f32.mrb[11].mxu0  ;;  %v1323_v49 = vpop.f32.mrb[11].mxu1 }
 0x507   :  { %v1083_v50 = vadd.f32 %v1082_v43, %v542_v42 }
 0x508   :  { %v1242_v51 = vmul.f32 -1.442695, %v1075_v46 }
 0x509   :  { %v1243_v52 = vmul.f32 -1.442695, %v1083_v50 }
 0x50a   :  { %1491 = vpow2.f32 %v1242_v51 }
 0x50b   :  { %1493 = vpow2.f32 %v1243_v52 }
 0x514   :  { %v1492_v53 = vpop.eup %1491 }
 0x515   :  { %v1079_v54 = vadd.f32 1.0, %v1492_v53  ;;  %v1494_v41 = vpop.eup %1493 }
 0x516   :  { %v1087_v56 = vadd.f32 1.0, %v1494_v41 }
 0x517   :  { %1495 = vrcp.f32 %v1079_v54 }
 0x518   :  { %1497 = vrcp.f32 %v1087_v56 }
 0x521   :  { %v1496_v59 = vpop.eup %1495 }
 0x522   :  { %v1091_v61 = vmul.f32 %v1496_v59, %v543_v58  ;;  %v1498_v63 = vpop.eup %1497 }
 0x523   :  { %v1094_v0 = vsub.f32 1.0, %v1498_v63  ;;  %v1096_v4 = vmul.f32 %v1498_v63, %v1680_v14 }
 0x524   :  { %v1092_v62 = vadd.f32 %v1091_v61, %v1090_v60 }
 0x526   :  { %1499 = vtanh.f32 %v1092_v62 }
 0x530   :  { %v1500_v2 = vpop.eup %1499 }
 0x531   :  { %v1095_v3 = vmul.f32 %v1500_v2, %v1094_v0 }
 0x533   :  { %v1097_v5 = vadd.f32 %v1096_v4, %v1095_v3 }
 0x535   :  { %1098 = vst [vmem:[#allocation7] sm:$0x1] %v1097_v5 }
 0x536   :  { %1578 = shalt.err (!%p1575_p0)
}
 0x537   :  { %s1579_s25 = scalar_lea.hbm %s1879_s7, 16 }
 0x538   :  { %p1580_p1 = scmp.ne.s32.totalorder %s1879_s7, %s1579_s25  ;;  %p1583_p2 = scmp.lt.u32.totalorder %s1579_s25, %s1879_s7 }
 0x53a   :  { %p1585_p3 = pnand %p1583_p2, %p1580_p1 }
 0x53c   :  { %1588 = shalt.err (!%p1585_p3)
}
 0x53d   :  { %1109 = dma.vmem_to_hbm [thread:$0]  %s1107_s22, 16, %s1879_s7, [#allocation4]  }
 0x53e   :  { %1593 = dma.done.wait [#allocation4], 16  }
 0x53f   :  { %1594 = vsyncadd [#allocation4], 4294967280 }
 0x540   :  { %1595 = dma.done.wait [#allocation9], 16  }
 0x541   :  { %1596 = vsyncadd [#allocation9], 4294967280 }
 0x542   :  { %1126 = vsyncpa [#allocation3], 1 }
 0x543   :  { %1127 = vsyncpa [#allocation6], 1 }
 0x544   :  { %1128 = vsyncpa [#allocation4], 1 }
 0x545   :  { %1129 = vsyncpa [#allocation9], 1 }

</bundles_post_ra>
